<compile_context>
chip_gen: v6e
topology: v6e:2x2x1
jax: 0.10.0
libtpu: 0.0.40
codegen_flags: <defaults>
</compile_context>

<pallas_src>
import jax
import jax.numpy as jnp
from jax.experimental import pallas as pl
from jax.experimental.pallas import tpu as pltpu

MAX_TILE_B = 512   # batch rows per grid step for large batches
OUT_PAD = 128      # output columns padded to one full lane group


def _round_up(n, m):
    return ((n + m - 1) // m) * m


def mlp_kernel(x_ref, w1_ref, b1_ref, w2_ref, b2_ref, w3_ref, b3_ref, o_ref):
    x = x_ref[...]                                   # (tile_b, 2) f32

    # hidden1 (+ ReLU): K = 2 -> VPU broadcast MAD, cheaper than an MXU op.
    h1 = (x[:, 0:1] * w1_ref[0:1, :]
          + x[:, 1:2] * w1_ref[1:2, :]
          + b1_ref[...])                             # (tile_b, 16)
    h1 = jnp.maximum(h1, 0.0)

    # hidden2 (+ ReLU): MXU, f32 accumulation.
    h2 = jnp.dot(h1, w2_ref[...], preferred_element_type=jnp.float32)
    h2 = jnp.maximum(h2 + b2_ref[...], 0.0)          # (tile_b, 16)

    # output layer into the lane-dense padded block (tile_b, 128).
    out = jnp.dot(h2, w3_ref[...], preferred_element_type=jnp.float32)
    o_ref[...] = (out + b3_ref[...]).astype(o_ref.dtype)


def mlp_forward(x, params):
    """x: [B, 2] float32. params: dict of (W, b) with W as [in, out], b as [1, out]."""
    w1, b1 = params["hidden1"]
    w2, b2 = params["hidden2"]
    w3, b3 = params["output"]

    B = x.shape[0]
    in_dim = x.shape[1]
    out_dim = w3.shape[1]                            # 10

    # Zero-pad the output layer to a full 128-lane group (lane-dense stores).
    w3p = jnp.zeros((w3.shape[0], OUT_PAD), jnp.float32).at[:, :out_dim].set(w3)
    b3p = jnp.zeros((1, OUT_PAD), jnp.float32).at[:, :out_dim].set(b3)

    # Adaptive batch tile: sublane-aligned, capped at MAX_TILE_B.
    tile_b = min(MAX_TILE_B, _round_up(B, 8))
    n_tiles = pl.cdiv(B, tile_b)
    B_pad = n_tiles * tile_b
    if B_pad != B:
        x = jnp.pad(x, ((0, B_pad - B), (0, 0)))

    def resident(shape):
        # Whole array, same block every grid step -> DMA'd once, stays in VMEM.
        return pl.BlockSpec(shape, lambda i: (0, 0))

    out_padded = pl.pallas_call(
        mlp_kernel,
        out_shape=jax.ShapeDtypeStruct((B_pad, OUT_PAD), jnp.float32),
        grid=(n_tiles,),
        in_specs=[
            pl.BlockSpec((tile_b, in_dim), lambda i: (i, 0)),   # x tile
            resident(w1.shape),
            resident(b1.shape),
            resident(w2.shape),
            resident(b2.shape),
            resident(w3p.shape),
            resident(b3p.shape),
        ],
        out_specs=pl.BlockSpec((tile_b, OUT_PAD), lambda i: (i, 0)),
        compiler_params=pltpu.CompilerParams(
            dimension_semantics=("parallel",),
        ),
    )(x, w1, b1, w2, b2, w3p, b3p)

    return out_padded[:B, :out_dim]


def init_params(key):
    """Deterministic init; shapes follow nn.Linear(out, in) transposed to [in, out]."""
    dims = [("hidden1", 2, 16), ("hidden2", 16, 16), ("output", 16, 10)]
    params = {}
    for name, fan_in, fan_out in dims:
        key, kw, kb = jax.random.split(key, 3)
        bound = 1.0 / jnp.sqrt(fan_in)
        w = jax.random.uniform(kw, (fan_in, fan_out), jnp.float32, -bound, bound)
        b = jax.random.uniform(kb, (1, fan_out), jnp.float32, -bound, bound)
        params[name] = (w, b)
    return params


def mlp_ref(x, params):
    """Plain-JAX reference for sanity checking."""
    w1, b1 = params["hidden1"]
    w2, b2 = params["hidden2"]
    w3, b3 = params["output"]
    h = jnp.maximum(x @ w1 + b1, 0.0)
    h = jnp.maximum(h @ w2 + b2, 0.0)
    return h @ w3 + b3


if __name__ == "__main__":
    key = jax.random.PRNGKey(0)
    key, kx = jax.random.split(key)

    batch = 8
    x = jax.random.normal(kx, (batch, 2), dtype=jnp.float32)

    params = init_params(key)

    y = mlp_forward(x, params)
    y = jax.block_until_ready(y)

    y_ref = mlp_ref(x, params)
    assert y.shape == (batch, 10)
    assert jnp.allclose(y, y_ref, atol=1e-5, rtol=1e-5)

    print("KERNEL_OK")
</pallas_src>

<mosaic_0001>
module attributes {stable_mosaic.version = 11 : i64} {
  func.func @mlp_kernel(%arg0: i32, %arg1: memref<8x2xf32, #tpu.memory_space<vmem>>, %arg2: memref<2x16xf32, #tpu.memory_space<vmem>>, %arg3: memref<1x16xf32, #tpu.memory_space<vmem>>, %arg4: memref<16x16xf32, #tpu.memory_space<vmem>>, %arg5: memref<1x16xf32, #tpu.memory_space<vmem>>, %arg6: memref<16x128xf32, #tpu.memory_space<vmem>>, %arg7: memref<1x128xf32, #tpu.memory_space<vmem>>, %arg8: memref<8x128xf32, #tpu.memory_space<vmem>>) attributes {dimension_semantics = [#tpu.dimension_semantics<parallel>], iteration_bounds = array<i64: 1>, scalar_prefetch = 0 : i64, scratch_operands = 0 : i64, tpu.core_type = #tpu.core_type<tc>, window_params = [{transform_indices = @transform_0, window_bounds = array<i64: 8, 2>}, {pipeline_mode = #tpu.pipeline_mode<synchronous>, transform_indices = @transform_1, window_bounds = array<i64: 2, 16>}, {pipeline_mode = #tpu.pipeline_mode<synchronous>, transform_indices = @transform_2, window_bounds = array<i64: 1, 16>}, {pipeline_mode = #tpu.pipeline_mode<synchronous>, transform_indices = @transform_3, window_bounds = array<i64: 16, 16>}, {pipeline_mode = #tpu.pipeline_mode<synchronous>, transform_indices = @transform_4, window_bounds = array<i64: 1, 16>}, {pipeline_mode = #tpu.pipeline_mode<synchronous>, transform_indices = @transform_5, window_bounds = array<i64: 16, 128>}, {pipeline_mode = #tpu.pipeline_mode<synchronous>, transform_indices = @transform_6, window_bounds = array<i64: 1, 128>}, {transform_indices = @transform_7, window_bounds = array<i64: 8, 128>}]} {
    %c0 = arith.constant 0 : index
    %c0_0 = arith.constant 0 : index
    %0 = vector.load %arg1[%c0, %c0_0] : memref<8x2xf32, #tpu.memory_space<vmem>>, vector<8x2xf32>
    %1 = vector.extract_strided_slice %0 {offsets = [0, 0], sizes = [8, 1], strides = [1, 1]} : vector<8x2xf32> to vector<8x1xf32>
    %c0_1 = arith.constant 0 : index
    %c0_2 = arith.constant 0 : index
    %2 = vector.load %arg2[%c0_1, %c0_2] : memref<2x16xf32, #tpu.memory_space<vmem>>, vector<1x16xf32>
    %3 = vector.broadcast %1 : vector<8x1xf32> to vector<8x16xf32>
    %4 = vector.broadcast %2 : vector<1x16xf32> to vector<8x16xf32>
    %5 = arith.mulf %3, %4 : vector<8x16xf32>
    %6 = vector.extract_strided_slice %0 {offsets = [0, 1], sizes = [8, 1], strides = [1, 1]} : vector<8x2xf32> to vector<8x1xf32>
    %c1 = arith.constant 1 : index
    %c0_3 = arith.constant 0 : index
    %7 = vector.load %arg2[%c1, %c0_3] : memref<2x16xf32, #tpu.memory_space<vmem>>, vector<1x16xf32>
    %8 = vector.broadcast %6 : vector<8x1xf32> to vector<8x16xf32>
    %9 = vector.broadcast %7 : vector<1x16xf32> to vector<8x16xf32>
    %10 = arith.mulf %8, %9 : vector<8x16xf32>
    %11 = arith.addf %5, %10 : vector<8x16xf32>
    %c0_4 = arith.constant 0 : index
    %c0_5 = arith.constant 0 : index
    %12 = vector.load %arg3[%c0_4, %c0_5] : memref<1x16xf32, #tpu.memory_space<vmem>>, vector<1x16xf32>
    %13 = vector.broadcast %12 : vector<1x16xf32> to vector<8x16xf32>
    %14 = arith.addf %11, %13 : vector<8x16xf32>
    %cst = arith.constant 0.000000e+00 : f32
    %15 = vector.broadcast %cst : f32 to vector<8x16xf32>
    %16 = arith.maximumf %14, %15 : vector<8x16xf32>
    %c0_6 = arith.constant 0 : index
    %c0_7 = arith.constant 0 : index
    %17 = vector.load %arg4[%c0_6, %c0_7] : memref<16x16xf32, #tpu.memory_space<vmem>>, vector<16x16xf32>
    %cst_8 = arith.constant dense<0.000000e+00> : vector<8x16xf32>
    %18 = tpu.matmul %16, %17, %cst_8 {dimension_numbers = #tpu.dot_dimension_numbers<[1], [0], [0], [1], [0, 0, 1, 1], [], []>} : vector<8x16xf32>, vector<16x16xf32>, vector<8x16xf32> -> vector<8x16xf32>
    %c0_9 = arith.constant 0 : index
    %c0_10 = arith.constant 0 : index
    %19 = vector.load %arg5[%c0_9, %c0_10] : memref<1x16xf32, #tpu.memory_space<vmem>>, vector<1x16xf32>
    %20 = vector.broadcast %19 : vector<1x16xf32> to vector<8x16xf32>
    %21 = arith.addf %18, %20 : vector<8x16xf32>
    %cst_11 = arith.constant 0.000000e+00 : f32
    %22 = vector.broadcast %cst_11 : f32 to vector<8x16xf32>
    %23 = arith.maximumf %21, %22 : vector<8x16xf32>
    %c0_12 = arith.constant 0 : index
    %c0_13 = arith.constant 0 : index
    %24 = vector.load %arg6[%c0_12, %c0_13] : memref<16x128xf32, #tpu.memory_space<vmem>>, vector<16x128xf32>
    %cst_14 = arith.constant dense<0.000000e+00> : vector<8x128xf32>
    %25 = tpu.matmul %23, %24, %cst_14 {dimension_numbers = #tpu.dot_dimension_numbers<[1], [0], [0], [1], [0, 0, 1, 1], [], []>} : vector<8x16xf32>, vector<16x128xf32>, vector<8x128xf32> -> vector<8x128xf32>
    %c0_15 = arith.constant 0 : index
    %c0_16 = arith.constant 0 : index
    %26 = vector.load %arg7[%c0_15, %c0_16] : memref<1x128xf32, #tpu.memory_space<vmem>>, vector<1x128xf32>
    %27 = vector.broadcast %26 : vector<1x128xf32> to vector<8x128xf32>
    %28 = arith.addf %25, %27 : vector<8x128xf32>
    %c0_17 = arith.constant 0 : index
    %c0_18 = arith.constant 0 : index
    %29 = vector.load %arg8[%c0_17, %c0_18] : memref<8x128xf32, #tpu.memory_space<vmem>>, vector<8x128xf32>
    tpu.vector_store %arg8[%c0_17, %c0_18], %28 {strides = array<i32>} : memref<8x128xf32, #tpu.memory_space<vmem>>, vector<8x128xf32>,
    return
  }
  func.func @transform_0(%arg0: i32) -> (i32, i32) {
    %c0_i32 = arith.constant 0 : i32
    %c0_i32_0 = arith.constant 0 : i32
    return %arg0, %c0_i32 : i32, i32
  }
  func.func @transform_1(%arg0: i32) -> (i32, i32) {
    %c0_i32 = arith.constant 0 : i32
    %c0_i32_0 = arith.constant 0 : i32
    %c0_i32_1 = arith.constant 0 : i32
    return %c0_i32, %c0_i32_0 : i32, i32
  }
  func.func @transform_2(%arg0: i32) -> (i32, i32) {
    %c0_i32 = arith.constant 0 : i32
    %c0_i32_0 = arith.constant 0 : i32
    %c0_i32_1 = arith.constant 0 : i32
    return %c0_i32, %c0_i32_0 : i32, i32
  }
  func.func @transform_3(%arg0: i32) -> (i32, i32) {
    %c0_i32 = arith.constant 0 : i32
    %c0_i32_0 = arith.constant 0 : i32
    %c0_i32_1 = arith.constant 0 : i32
    return %c0_i32, %c0_i32_0 : i32, i32
  }
  func.func @transform_4(%arg0: i32) -> (i32, i32) {
    %c0_i32 = arith.constant 0 : i32
    %c0_i32_0 = arith.constant 0 : i32
    %c0_i32_1 = arith.constant 0 : i32
    return %c0_i32, %c0_i32_0 : i32, i32
  }
  func.func @transform_5(%arg0: i32) -> (i32, i32) {
    %c0_i32 = arith.constant 0 : i32
    %c0_i32_0 = arith.constant 0 : i32
    %c0_i32_1 = arith.constant 0 : i32
    return %c0_i32, %c0_i32_0 : i32, i32
  }
  func.func @transform_6(%arg0: i32) -> (i32, i32) {
    %c0_i32 = arith.constant 0 : i32
    %c0_i32_0 = arith.constant 0 : i32
    %c0_i32_1 = arith.constant 0 : i32
    return %c0_i32, %c0_i32_0 : i32, i32
  }
  func.func @transform_7(%arg0: i32) -> (i32, i32) {
    %c0_i32 = arith.constant 0 : i32
    %c0_i32_0 = arith.constant 0 : i32
    return %arg0, %c0_i32 : i32, i32
  }
}

</mosaic_0001>

<bundles_post_ra>
// kernel: tpu_custom_call.1
= control target key start
LH: loop header
LB: loop body
LE: loop exit
PB: predicated region body
PF: predicated region fallthrough
CT: control target
= control target key end

     0   :  { %12 = vsyncpa [#allocation3], 0  ;;  %s451_s0 = inlined_call_operand.vmem [shape: f32[8,2], index: 0, kind: input, shape index: {}]   ;;  %s452_s1 = inlined_call_operand.vmem [shape: f32[2,16], index: 1, kind: input, shape index: {}]   ;;  %s453_s2 = inlined_call_operand.vmem [shape: f32[1,16], index: 2, kind: input, shape index: {}]   ;;  %s454_s3 = inlined_call_operand.hbm [shape: f32[16,16], index: 3, kind: input, shape index: {}]   ;;  %s455_s4 = inlined_call_operand.hbm [shape: f32[1,16], index: 4, kind: input, shape index: {}]   ;;  %s456_s5 = inlined_call_operand.vmem [shape: f32[16,128], index: 5, kind: input, shape index: {}]   ;;  %s457_s6 = inlined_call_operand.vmem [shape: f32[1,128], index: 6, kind: input, shape index: {}]   ;;  %s458_s7 = inlined_call_operand.hbm [shape: f32[8,128], index: 7, kind: output, shape index: {}]  }
   0x1   :  { %13 = vsyncpa [#allocation6], 0 }
   0x2   :  { %14 = vsyncpa [#allocation4], 0  ;;  %s372_s24 = smov [#allocation2]  }
   0x3   :  { %s26_s25 = sshll.u32 %s372_s24, 4  ;;  %s27_s25 = int_to_ptr.vmem [resolvable:$true] %s26_s25 }
   0x4   :  { %s314_s26 = scalar_lea.vmem %s27_s25, 256  ;;  %p319_p1 = scmp.lt.s32.totalorder %s27_s25, %s27_s25 }
   0x5   :  { %p315_p0 = scmp.ne.s32.totalorder %s27_s25, %s314_s26  ;;  %p320_p2 = scmp.lt.s32.totalorder %s314_s26, %s314_s26 }
   0x7   :  { %p321_p3 = por %p320_p2, %p319_p1 }
   0x9   :  { %p322_p4 = pnand %p321_p3, %p315_p0 }
   0xb   :  { %325 = shalt.err (!%p322_p4)
}
   0xc   :  { %s373_s27 = smov 128   ;;  %s374_s28 = smov 8  }
   0xd   :  { %32 = dma.hbm_to_vmem [thread:$0]  %s454_s3, 256, %s27_s25, [#allocation3], %s373_s27, %s373_s27, %s374_s28  }
   0xe   :  { %s375_s8 = smov [#allocation5]  }
   0xf   :  { %s39_s9 = sshll.u32 %s375_s8, 4  ;;  %s40_s9 = int_to_ptr.vmem [resolvable:$true] %s39_s9 }
  0x10   :  { %s334_s10 = scalar_lea.vmem %s40_s9, 16  ;;  %s338_s11 = scalar_lea.vmem %s40_s9, 32 }
  0x11   :  { %p335_p5 = scmp.ne.s32.totalorder %s40_s9, %s334_s10  ;;  %p339_p6 = scmp.lt.s32.totalorder %s40_s9, %s40_s9 }
  0x12   :  { %p340_p7 = scmp.lt.s32.totalorder %s338_s11, %s334_s10 }
  0x14   :  { %p341_p8 = por %p340_p7, %p339_p6 }
  0x16   :  { %p342_p9 = pnand %p341_p8, %p335_p5 }
  0x18   :  { %345 = shalt.err (!%p342_p9)
}
  0x19   :  { %42 = dma.hbm_to_vmem [thread:$0]  %s455_s4, 16, %s40_s9, [#allocation6]  }
  0x1a   :  { %366 = dma.done.wait [#allocation3], 256  }
  0x1b   :  { %367 = vsyncadd [#allocation3], 4294967040 }
  0x1c   :  { %368 = dma.done.wait [#allocation6], 16  }
  0x1d   :  { %369 = vsyncadd [#allocation6], 4294967280  ;;  %v376_v0 = vmov 0   ;;  %v53_v1 = vld [vmem:[%s451_s0] sm:$0xff]  ;;  %v377_v2 = vmov 1   ;;  %v378_v3 = vmov 0.0  }
  0x1e   :  { %304 = vset.pattern.permute.xlu0 %v376_v0  ;;  %281 = vmatprep.subr.mxu0 %v378_v3  ;;  %v86_v4 = vld [vmem:[#allocation2 + $0x8] sm:$0xff]  ;;  %v85_v5 = vld [vmem:[#allocation2] sm:$0xff]  ;;  %vm379_vm0 = vmmov 0   ;;  %vm94_vm1 = vcmask 130048   ;;  %v271_v18 = vld [vmem:[#allocation5] ss:$0 sm:$0xff] }
  0x1f   :  { %57 = vperm.xlu0 %304, %v53_v1   ;;  %282 = vmatpush3.msra.mxu0 %v86_v4  ;;  %v268_v7 = vld [vmem:[%s452_s1] ss:$0 sm:$0xff]  ;;  %v269_v8 = vld [vmem:[%s452_s1 + $0x1] ss:$0 sm:$0xff]  ;;  %v170_v16 = vld [vmem:[%s456_s5 + $0x8] sm:$0xff]  ;;  %s380_s23 = smov [#allocation7]  }
  0x20   :  { %288 = vmatprep.subr.mxu1 %v378_v3  ;;  %283 = vmatprep.subr.mxu0 %v378_v3  ;;  %v270_v12 = vld [vmem:[%s453_s2] ss:$0 sm:$0xff]  ;;  %s258_s24 = sshll.u32 %s380_s23, 4  ;;  %s259_s24 = int_to_ptr.vmem [resolvable:$true] %s258_s24 }
  0x21   :  { %284 = vmatpush3.msra.mxu0 %v85_v5  ;;  %285 = vmatprep.mubr.msk.f32.mxu0 %vm379_vm0, %v378_v3  ;;  %v169_v17 = vld [vmem:[%s456_s5] sm:$0xff]  ;;  %s346_s25 = scalar_lea.vmem %s259_s24, 128  ;;  %p351_p11 = scmp.lt.s32.totalorder %s259_s24, %s259_s24 }
  0x22   :  { %292 = vmatprep.mubr.msk.f32.mxu1 %vm379_vm0, %v378_v3  ;;  %289 = vmatpush3.msra.mxu1 %v170_v16  ;;  %v273_v23 = vld [vmem:[%s457_s6] ss:$0 sm:$0xff]  ;;  %p347_p10 = scmp.ne.s32.totalorder %s259_s24, %s346_s25  ;;  %p352_p12 = scmp.lt.s32.totalorder %s346_s25, %s346_s25 }
  0x23   :  { %305 = vset.pattern.permute.xlu0 %v377_v2  ;;  %290 = vmatprep.subr.mxu1 %v378_v3 }
  0x24   :  { %67 = vperm.xlu0 %305, %v53_v1   ;;  %291 = vmatpush3.msra.mxu1 %v169_v17  ;;  %p353_p13 = por %p352_p12, %p351_p11 }
  0x26   :  { %p354_p0 = pnand %p353_p13, %p347_p10 }
  0x9a   :  { %v58_v6 = vpop.permute.xlu0 %57 }
  0x9b   :  { %v64_v10 = vmul.f32 %v268_v7, %v58_v6 }
  0x9f   :  { %v68_v9 = vpop.permute.xlu0 %67 }
  0xa0   :  { %v74_v11 = vmul.f32 %v269_v8, %v68_v9 }
  0xa2   :  { %v75_v13 = vadd.f32 %v74_v11, %v64_v10 }
  0xa4   :  { %v83_v14 = vadd.f32 %v270_v12, %v75_v13 }
  0xa6   :  { %v84_v15 = vmax.f32 %v83_v14, 0.0 }
  0xa8   :  { %286 = vmatmul.mubr.msk.f32.vlgmr.msra.gmra.mxu0 %vm94_vm1, %v84_v15 }
 0x168   :  { %v164_v19 = vpop.f32.mrf.mxu0 }
 0x169   :  { %v165_v20 = vadd.f32 %v271_v18, %v164_v19 }
 0x16a   :  { %v287_v21 = vpop.f32.mrf.mxu0 }
 0x16b   :  { %v168_v22 = vmax.f32 %v165_v20, 0.0 }
 0x16d   :  { %293 = vmatmul.mubr.msk.f32.vlgmr.msra.gmra.mxu1 %vm94_vm1, %v168_v22 }
 0x22d   :  { %v247_v24 = vpop.f32.mrf.mxu1 }
 0x22e   :  { %v248_v25 = vadd.f32 %v273_v23, %v247_v24 }
 0x22f   :  { %v294_v26 = vpop.f32.mrf.mxu1 }
 0x230   :  { %251 = vst [vmem:[#allocation7] sm:$0xff] %v248_v25 }
 0x231   :  { %357 = shalt.err (!%p354_p0)
}
 0x232   :  { %261 = dma.vmem_to_hbm [thread:$0]  %s259_s24, 128, %s458_s7, [#allocation4]  }
 0x233   :  { %370 = dma.done.wait [#allocation4], 128  }
 0x234   :  { %371 = vsyncadd [#allocation4], 4294967168 }
 0x235   :  { %265 = vsyncpa [#allocation3], 1 }
 0x236   :  { %266 = vsyncpa [#allocation6], 1 }
 0x237   :  { %267 = vsyncpa [#allocation4], 1 }

</bundles_post_ra>
